<compile_context>
chip_gen: v7x
topology: tpu7x:2x2x1
jax: 0.10.0
libtpu: 0.0.40
codegen_flags: <defaults>
</compile_context>

<pallas_src>
import jax
import jax.numpy as jnp
from jax.experimental import pallas as pl
from jax.experimental.pallas import tpu as pltpu

LANE = 128
SUBLANE = 8


def _auto_num_chunks():
    # 2 TensorCores per chip only on v7x-class parts; v5e/v6e are single-TC,
    # where a second chunk buys nothing but mask overhead + a duplicate
    # clamped tile read.
    try:
        kind = jax.devices()[0].device_kind.lower()
    except Exception:
        return 1
    return 2 if "v7" in kind else 1


def mse_loss_pallas(hypothesis, target, *, tile_rows=None, num_chunks=None):
    """Equivalent of nn.MSELoss()(hypothesis, target) (mean reduction)."""
    assert hypothesis.shape == target.shape
    n = hypothesis.size
    if n == 0:
        # mean over an empty tensor (torch returns NaN)
        return jnp.float32(jnp.nan)

    h = hypothesis.reshape(-1)
    t = target.reshape(-1)
    itemsize = max(jnp.dtype(h.dtype).itemsize, jnp.dtype(t.dtype).itemsize)

    # Pad flat length to a multiple of 128 lanes and at least 8 rows.  Only
    # ragged (n % 128 != 0) or tiny (< 1024 element) inputs pay this copy;
    # aligned inputs stream with zero extra HBM traffic.  Padded elements are
    # zeros, so they contribute nothing to the sum of squared diffs.
    padded_len = max(-(-n // LANE) * LANE, SUBLANE * LANE)
    pad = padded_len - n
    if pad:
        h = jnp.pad(h, (0, pad))
        t = jnp.pad(t, (0, pad))
    rows = padded_len // LANE

    h2 = h.reshape(rows, LANE)
    t2 = t.reshape(rows, LANE)

    # Tile sizing: ~4 MiB per input block by default (8192 rows f32 / 16384
    # rows bf16), always a multiple of 8 sublanes, never larger than the array.
    if tile_rows is None:
        tile_rows = max(SUBLANE, (4 << 20) // (LANE * itemsize))
    tile_rows = max(SUBLANE, (int(tile_rows) // SUBLANE) * SUBLANE)
    tile_rows = min(tile_rows, (rows // SUBLANE) * SUBLANE)

    if num_chunks is None:
        num_chunks = _auto_num_chunks()

    num_tiles = pl.cdiv(rows, tile_rows)
    num_chunks = max(1, min(int(num_chunks), num_tiles))   # parallel axis (v7x: 2 TCs)
    tiles_per_chunk = pl.cdiv(num_tiles, num_chunks)
    covered_rows = num_chunks * tiles_per_chunk * tile_rows
    # Invariant: needs_mask is True whenever any block can be partial, OOB, or
    # clamped-duplicate; only then does the boundary-mask branch get emitted.
    needs_mask = covered_rows != rows

    def kernel(h_ref, t_ref, o_ref):
        c = pl.program_id(0)   # parallel chunk
        i = pl.program_id(1)   # reduction step within chunk

        @pl.when(i == 0)
        def _():
            o_ref[...] = jnp.zeros_like(o_ref)

        d = h_ref[...].astype(jnp.float32) - t_ref[...].astype(jnp.float32)
        sq = d * d

        def fold(x):
            # (tile_rows, 128) -> (8, 128): layout-preserving reshape, then a
            # pure-VPU reduction over the leading (non-layout) axis.
            return x.reshape(tile_rows // SUBLANE, SUBLANE, LANE).sum(axis=0)

        if needs_mask:
            row0 = (c * tiles_per_chunk + i) * tile_rows
            fully_in = row0 + tile_rows <= rows

            @pl.when(fully_in)
            def _():
                # Hot path: no iota, no select.
                o_ref[...] += fold(sq)

            @pl.when(jnp.logical_not(fully_in))
            def _():
                # Boundary / clamped / fully-OOB block: zero rows past the
                # real array (covers any garbage from the partial DMA; padded
                # lane-tail elements are zeros already).
                ridx = row0 + jax.lax.broadcasted_iota(jnp.int32, (tile_rows, 1), 0)
                o_ref[...] += fold(jnp.where(ridx < rows, sq, 0.0))
        else:
            o_ref[...] += fold(sq)

    def in_index(c, i):
        # Clamp so no DMA ever starts past the last block; blocks whose
        # intended index is out of range are fully masked to zero in-kernel
        # (needs_mask is guaranteed True whenever clamping can occur).
        return (jnp.minimum(c * tiles_per_chunk + i, num_tiles - 1), 0)

    block_bytes = tile_rows * LANE * itemsize
    vmem_limit = int(min(40 << 20, max(16 << 20, 4 * block_bytes + (8 << 20))))

    cost = pl.CostEstimate(
        flops=3 * n,
        transcendentals=0,
        bytes_accessed=2 * rows * LANE * itemsize + num_chunks * SUBLANE * LANE * 4,
    )

    partials = pl.pallas_call(
        kernel,
        out_shape=jax.ShapeDtypeStruct((num_chunks * SUBLANE, LANE), jnp.float32),
        grid_spec=pltpu.PrefetchScalarGridSpec(
            num_scalar_prefetch=0,
            grid=(num_chunks, tiles_per_chunk),
            in_specs=[
                pl.BlockSpec((tile_rows, LANE), in_index),
                pl.BlockSpec((tile_rows, LANE), in_index),
            ],
            out_specs=pl.BlockSpec((SUBLANE, LANE), lambda c, i: (c, 0)),
        ),
        compiler_params=pltpu.CompilerParams(
            dimension_semantics=("parallel", "arbitrary"),
            vmem_limit_bytes=vmem_limit,
        ),
        cost_estimate=cost,
    )(h2, t2)

    # Tiny epilogue: sublane/lane/chunk fold + multiply by 1/N.
    return (partials.sum() * jnp.float32(1.0 / n)).astype(jnp.float32)


if __name__ == "__main__":
    key = jax.random.PRNGKey(0)
    k1, k2, k3, k4, k5, k6 = jax.random.split(key, 6)

    # --- Main check: small shapes consistent with the module's forward. ---
    hypothesis = jax.random.normal(k1, (2, 4, 16, 16), dtype=jnp.float32)
    target = jax.random.normal(k2, (2, 4, 16, 16), dtype=jnp.float32)
    loss = jax.block_until_ready(mse_loss_pallas(hypothesis, target))
    ref = jnp.mean((hypothesis - target) ** 2)
    assert jnp.allclose(loss, ref, rtol=1e-5, atol=1e-6), (loss, ref)

    # --- Ragged size + multi-tile + forced 2-chunk (mask / clamp paths). ---
    h2 = jax.random.normal(k3, (2, 3, 20, 19), dtype=jnp.float32)  # 2280 elems
    t2 = jax.random.normal(k4, (2, 3, 20, 19), dtype=jnp.float32)
    loss2 = jax.block_until_ready(mse_loss_pallas(h2, t2, tile_rows=8, num_chunks=2))
    ref2 = jnp.mean((h2 - t2) ** 2)
    assert jnp.allclose(loss2, ref2, rtol=1e-5, atol=1e-6), (loss2, ref2)

    # --- Lane-aligned but rows % 8 != 0: no wrapper pad, boundary block is
    #     masked in-kernel (exercises the partial-DMA garbage path). ---
    h3 = jax.random.normal(k5, (18, 128), dtype=jnp.float32)
    t3 = jax.random.normal(k6, (18, 128), dtype=jnp.float32)
    loss3 = jax.block_until_ready(mse_loss_pallas(h3, t3))
    ref3 = jnp.mean((h3 - t3) ** 2)
    assert jnp.allclose(loss3, ref3, rtol=1e-5, atol=1e-6), (loss3, ref3)

    # --- Native bf16 inputs streamed without a wrapper cast. ---
    hb = hypothesis.astype(jnp.bfloat16)
    tb = target.astype(jnp.bfloat16)
    loss4 = jax.block_until_ready(mse_loss_pallas(hb, tb))
    ref4 = jnp.mean((hb.astype(jnp.float32) - tb.astype(jnp.float32)) ** 2)
    assert jnp.allclose(loss4, ref4, rtol=1e-5, atol=1e-6), (loss4, ref4)

    print("KERNEL_OK")
</pallas_src>

<mosaic_0001>
module attributes {stable_mosaic.version = 11 : i64} {
  func.func @kernel(%arg0: i32, %arg1: i32, %arg2: memref<16x128xf32, #tpu.memory_space<vmem>>, %arg3: memref<16x128xf32, #tpu.memory_space<vmem>>, %arg4: memref<8x128xf32, #tpu.memory_space<vmem>>) attributes {dimension_semantics = [#tpu.dimension_semantics<parallel>, #tpu.dimension_semantics<arbitrary>], iteration_bounds = array<i64: 1, 1>, scalar_prefetch = 0 : i64, scratch_operands = 0 : i64, tpu.core_type = #tpu.core_type<tc>, window_params = [{transform_indices = @transform_0, window_bounds = array<i64: 16, 128>}, {transform_indices = @transform_1, window_bounds = array<i64: 16, 128>}, {transform_indices = @transform_2, window_bounds = array<i64: 8, 128>}]} {
    %c0_i32 = arith.constant 0 : i32
    %0 = arith.cmpi eq, %arg1, %c0_i32 : i32
    %1 = arith.extui %0 : i1 to i32
    %c0_i32_0 = arith.constant 0 : i32
    %2 = arith.cmpi ne, %1, %c0_i32_0 : i32
    scf.if %2 {
      %cst_8 = arith.constant 0.000000e+00 : f32
      %12 = vector.broadcast %cst_8 : f32 to vector<8x128xf32>
      %c0_9 = arith.constant 0 : index
      %c0_10 = arith.constant 0 : index
      %13 = vector.load %arg4[%c0_9, %c0_10] : memref<8x128xf32, #tpu.memory_space<vmem>>, vector<8x128xf32>
      tpu.vector_store %arg4[%c0_9, %c0_10], %12 {strides = array<i32>} : memref<8x128xf32, #tpu.memory_space<vmem>>, vector<8x128xf32>,
    } else {
    }
    %c0 = arith.constant 0 : index
    %c0_1 = arith.constant 0 : index
    %3 = vector.load %arg2[%c0, %c0_1] : memref<16x128xf32, #tpu.memory_space<vmem>>, vector<16x128xf32>
    %c0_2 = arith.constant 0 : index
    %c0_3 = arith.constant 0 : index
    %4 = vector.load %arg3[%c0_2, %c0_3] : memref<16x128xf32, #tpu.memory_space<vmem>>, vector<16x128xf32>
    %5 = arith.subf %3, %4 : vector<16x128xf32>
    %6 = arith.mulf %5, %5 : vector<16x128xf32>
    %c0_4 = arith.constant 0 : index
    %c0_5 = arith.constant 0 : index
    %7 = vector.load %arg4[%c0_4, %c0_5] : memref<8x128xf32, #tpu.memory_space<vmem>>, vector<8x128xf32>
    %8 = vector.shape_cast %6 : vector<16x128xf32> to vector<2x8x128xf32>
    %cst = arith.constant dense<0.000000e+00> : vector<8x128xf32>
    %9 = vector.multi_reduction <add>, %8, %cst [0] : vector<2x8x128xf32> to vector<8x128xf32>
    %10 = arith.addf %7, %9 : vector<8x128xf32>
    %c0_6 = arith.constant 0 : index
    %c0_7 = arith.constant 0 : index
    %11 = vector.load %arg4[%c0_6, %c0_7] : memref<8x128xf32, #tpu.memory_space<vmem>>, vector<8x128xf32>
    tpu.vector_store %arg4[%c0_6, %c0_7], %10 {strides = array<i32>} : memref<8x128xf32, #tpu.memory_space<vmem>>, vector<8x128xf32>,
    return
  }
  func.func @transform_0(%arg0: i32, %arg1: i32) -> (i32, i32) {
    %c1_i32 = arith.constant 1 : i32
    %0 = arith.muli %arg0, %c1_i32 : i32
    %1 = arith.addi %0, %arg1 : i32
    %c0_i32 = arith.constant 0 : i32
    %2 = arith.minsi %1, %c0_i32 : i32
    %c0_i32_0 = arith.constant 0 : i32
    %c0_i32_1 = arith.constant 0 : i32
    return %2, %c0_i32_0 : i32, i32
  }
  func.func @transform_1(%arg0: i32, %arg1: i32) -> (i32, i32) {
    %c1_i32 = arith.constant 1 : i32
    %0 = arith.muli %arg0, %c1_i32 : i32
    %1 = arith.addi %0, %arg1 : i32
    %c0_i32 = arith.constant 0 : i32
    %2 = arith.minsi %1, %c0_i32 : i32
    %c0_i32_0 = arith.constant 0 : i32
    %c0_i32_1 = arith.constant 0 : i32
    return %2, %c0_i32_0 : i32, i32
  }
  func.func @transform_2(%arg0: i32, %arg1: i32) -> (i32, i32) {
    %c0_i32 = arith.constant 0 : i32
    %c0_i32_0 = arith.constant 0 : i32
    return %arg0, %c0_i32 : i32, i32
  }
}

</mosaic_0001>

<bundles_post_ra>
// kernel: tpu_custom_call.1
= control target key start
LH: loop header
LB: loop body
LE: loop exit
PB: predicated region body
PF: predicated region fallthrough
CT: control target
= control target key end

     0   :  { %7 = vsyncpa [#allocation3], 0  ;;  %s231_s0 = inlined_call_operand.hbm [shape: f32[16,128], index: 0, kind: input, shape index: {}]   ;;  %s232_s1 = inlined_call_operand.hbm [shape: f32[16,128], index: 1, kind: input, shape index: {}]   ;;  %s233_s2 = inlined_call_operand.hbm [shape: f32[8,128], index: 2, kind: output, shape index: {}]  }
   0x1   :  { %8 = vsyncpa [#allocation6], 0 }
   0x2   :  { %9 = vsyncpa [#allocation4], 0  ;;  %s175_s9 = smov [#allocation2]   ;;  %s103_s13 = scalar_lea.hbm %s231_s0, 256 }
   0x3   :  { %s21_s10 = sshll.u32 %s175_s9, 4  ;;  %p104_p0 = scmp.ne.s32.totalorder %s231_s0, %s103_s13  ;;  %s22_s10 = int_to_ptr.vmem [resolvable:$true] %s21_s10 }
   0x4   :  { %p107_p1 = scmp.lt.u32.totalorder %s103_s13, %s231_s0 }
   0x6   :  { %p109_p2 = pnand %p107_p1, %p104_p0 }
   0x8   :  { %112 = shalt.err (!%p109_p2)
}
   0x9   :  { %s113_s18 = scalar_lea.vmem %s22_s10, 256  ;;  %p118_p4 = scmp.lt.s32.totalorder %s22_s10, %s22_s10 }
   0xa   :  { %p114_p3 = scmp.ne.s32.totalorder %s22_s10, %s113_s18  ;;  %p119_p5 = scmp.lt.s32.totalorder %s113_s18, %s113_s18 }
   0xc   :  { %p120_p6 = por %p119_p5, %p118_p4 }
   0xe   :  { %p121_p7 = pnand %p120_p6, %p114_p3 }
  0x10   :  { %124 = shalt.err (!%p121_p7)
}
  0x11   :  { %s176_s19 = smov 128   ;;  %s177_s20 = smov 8  }
  0x12   :  { %27 = dma.hbm_to_vmem [thread:$0]  %s231_s0, 256, %s22_s10, [#allocation3], %s176_s19, %s176_s19, %s177_s20  }
  0x13   :  { %s178_s23 = smov [#allocation5]   ;;  %s125_s27 = scalar_lea.hbm %s232_s1, 256 }
  0x14   :  { %s39_s24 = sshll.u32 %s178_s23, 4  ;;  %p126_p8 = scmp.ne.s32.totalorder %s232_s1, %s125_s27  ;;  %s40_s24 = int_to_ptr.vmem [resolvable:$true] %s39_s24 }
  0x15   :  { %p129_p9 = scmp.lt.u32.totalorder %s125_s27, %s232_s1 }
  0x17   :  { %p131_p10 = pnand %p129_p9, %p126_p8 }
  0x19   :  { %134 = shalt.err (!%p131_p10)
}
  0x1a   :  { %s135_s4 = scalar_lea.vmem %s40_s24, 256  ;;  %p140_p12 = scmp.lt.s32.totalorder %s40_s24, %s40_s24 }
  0x1b   :  { %p136_p11 = scmp.ne.s32.totalorder %s40_s24, %s135_s4  ;;  %p141_p13 = scmp.lt.s32.totalorder %s135_s4, %s135_s4 }
  0x1d   :  { %p142_p0 = por %p141_p13, %p140_p12 }
  0x1f   :  { %p143_p1 = pnand %p142_p0, %p136_p11 }
  0x21   :  { %146 = shalt.err (!%p143_p1)
}
  0x22   :  { %45 = dma.hbm_to_vmem [thread:$0]  %s232_s1, 256, %s40_s24, [#allocation6], %s176_s19, %s176_s19, %s177_s20  }
  0x23   :  { %169 = dma.done.wait [#allocation3], 256  }
  0x24   :  { %170 = vsyncadd [#allocation3], 4294967040 }
  0x25   :  { %171 = dma.done.wait [#allocation6], 256  }
  0x26   :  { %172 = vsyncadd [#allocation6], 4294967040  ;;  %v65_v0 = vld [vmem:[#allocation2] sm:$0xff]  ;;  %v66_v1 = vld [vmem:[#allocation2 + $0x8] sm:$0xff]  ;;  %s179_s6 = smov [#allocation7]  }
  0x27   :  { %v67_v2 = vld [vmem:[#allocation5] sm:$0xff]  ;;  %v68_v3 = vld [vmem:[#allocation5 + $0x8] sm:$0xff]  ;;  %s83_s7 = sshll.u32 %s179_s6, 4  ;;  %s84_s7 = int_to_ptr.vmem [resolvable:$true] %s83_s7 }
  0x28   :  { %v69_v4 = vsub.f32 %v65_v0, %v67_v2  ;;  %v70_v5 = vsub.f32 %v66_v1, %v68_v3  ;;  %s147_s8 = scalar_lea.vmem %s84_s7, 128  ;;  %p152_p3 = scmp.lt.s32.totalorder %s84_s7, %s84_s7 }
  0x29   :  { %p148_p2 = scmp.ne.s32.totalorder %s84_s7, %s147_s8  ;;  %p153_p4 = scmp.lt.s32.totalorder %s147_s8, %s147_s8 }
  0x2a   :  { %v71_v6 = vmul.f32 %v69_v4, %v69_v4  ;;  %v72_v7 = vmul.f32 %v70_v5, %v70_v5 }
  0x2b   :  { %p154_p5 = por %p153_p4, %p152_p3 }
  0x2c   :  { %v74_v8 = vadd.f32 %v72_v7, %v71_v6 }
  0x2d   :  { %p155_p6 = pnand %p154_p5, %p148_p2 }
  0x2e   :  { %76 = vst [vmem:[#allocation7] sm:$0xff] %v74_v8 }
  0x2f   :  { %158 = shalt.err (!%p155_p6)
}
  0x30   :  { %s159_s10 = scalar_lea.hbm %s233_s2, 128 }
  0x31   :  { %p160_p7 = scmp.ne.s32.totalorder %s233_s2, %s159_s10  ;;  %p163_p8 = scmp.lt.u32.totalorder %s159_s10, %s233_s2 }
  0x33   :  { %p165_p9 = pnand %p163_p8, %p160_p7 }
  0x35   :  { %168 = shalt.err (!%p165_p9)
}
  0x36   :  { %86 = dma.vmem_to_hbm [thread:$0]  %s84_s7, 128, %s233_s2, [#allocation4]  }
  0x37   :  { %173 = dma.done.wait [#allocation4], 128  }
  0x38   :  { %174 = vsyncadd [#allocation4], 4294967168 }
  0x39   :  { %90 = vsyncpa [#allocation3], 1 }
  0x3a   :  { %91 = vsyncpa [#allocation6], 1 }
  0x3b   :  { %92 = vsyncpa [#allocation4], 1 }

</bundles_post_ra>
